<compile_context>
chip_gen: v6e
topology: v6e:2x2x1
jax: 0.10.0
libtpu: 0.0.40
codegen_flags: <defaults>
</compile_context>

<pallas_src>
import functools

import jax
import jax.numpy as jnp
from jax.experimental import pallas as pl
from jax.experimental.pallas import tpu as pltpu


def _round_up(x, m):
    return ((x + m - 1) // m) * m


def _device_defaults():
    """Per-TPU-generation tiling / VMEM defaults (roofline-driven)."""
    kind = ""
    try:
        kind = (jax.devices()[0].device_kind or "").lower()
    except Exception:
        pass
    if "v7" in kind:
        # 64 MiB VMEM/TC: stay well under physical; fc=256 is one native MXU K
        # pass; tq=512 keeps the (megacore-duplicated) weight streaming amortized.
        return dict(tq=512, f_chunk=256, align=256, vmem_cap=52 * 2**20)
    if "v6" in kind:
        # 128 MiB VMEM: spend it on a big token tile (knee ~700 FLOPs/byte).
        return dict(tq=1024, f_chunk=512, align=256, vmem_cap=100 * 2**20)
    if "v5" in kind and ("lite" in kind or "5e" in kind):
        # v5e knee ~240 FLOPs/byte: tq=256 already near compute-bound; 128-wide MXU.
        return dict(tq=256, f_chunk=512, align=128, vmem_cap=96 * 2**20)
    if "v5" in kind:  # v5p
        return dict(tq=512, f_chunk=512, align=128, vmem_cap=96 * 2**20)
    # unknown generation: conservative
    return dict(tq=512, f_chunk=512, align=128, vmem_cap=64 * 2**20)


def _choose_f_chunk(F, target):
    """Largest divisor of F that is a multiple of 128 and <= target,
    preferring multiples of 256 (native 256-wide MXU on v6e/v7x)."""
    if F % 128 != 0:
        return F
    best, best256 = 128, None
    for cand in range(128, max(128, min(F, target)) + 1, 128):
        if F % cand == 0:
            best = cand
            if cand % 256 == 0:
                best256 = cand
    return best256 if best256 is not None else best


def _pick_token_tile(T, tq_target, align):
    """Choose (token tile, padded T).  Prefer tiles that divide T (no padding ->
    no post-kernel slice / extra HBM output copy) and that are MXU-aligned."""
    tq_target = max(8, tq_target)
    if T <= tq_target:
        t8 = _round_up(T, 8)
        return t8, t8
    best = 0
    for cand in range(align, tq_target + 1, align):       # MXU-aligned divisor
        if T % cand == 0:
            best = cand
    if best == 0:
        for cand in range(8, tq_target + 1, 8):           # any 8-aligned divisor
            if T % cand == 0:
                best = cand
    if best:
        return best, T
    n_tiles = -(-T // tq_target)                          # pad: balanced tiles
    tq_eff = _round_up(-(-T // n_tiles), 8)
    return tq_eff, n_tiles * tq_eff


def _token_shift(x_ref, bnd_ref):
    """In-kernel RWKV token shift: returns (x_f32, x_prev - x) for this tile."""
    x = x_ref[...].astype(jnp.float32)                      # (tq, C)
    rolled = pltpu.roll(x, shift=1, axis=0)                 # rolled[i] = x[i-1]
    row_idx = jax.lax.broadcasted_iota(jnp.int32, x.shape, 0)
    x_prev = jnp.where(row_idx == 0,
                       bnd_ref[...].astype(jnp.float32),    # (1, C) boundary row
                       rolled)
    return x, x_prev - x


def _kernel_resident_wr(x_ref, bnd_ref, mk_ref, mr_ref,
                        wk_ref, wv_ref, wr_ref, out_ref,
                        xk_sc, r_sc, kv_sc):
    """Fallback path: Wr kept whole (used when F is not chunked or C does not
    split evenly across the f steps)."""
    f = pl.program_id(2)
    nf = pl.num_programs(2)

    @pl.when(f == 0)
    def _init():
        x, xx = _token_shift(x_ref, bnd_ref)
        # receptance path first so its f32 temporaries die before the key path
        xr = x + xx * mr_ref[...].astype(jnp.float32)
        r = jnp.dot(xr.astype(wr_ref.dtype), wr_ref[...],
                    preferred_element_type=jnp.float32)
        r_sc[...] = jax.nn.sigmoid(r)
        xk_sc[...] = (x + xx * mk_ref[...].astype(jnp.float32)).astype(xk_sc.dtype)
        kv_sc[...] = jnp.zeros_like(kv_sc)

    # F-chunked key/value path: k = relu(xk @ Wk_chunk)^2 ; kv += k @ Wv_chunk
    k = jnp.dot(xk_sc[...], wk_ref[...], preferred_element_type=jnp.float32)
    k = jnp.maximum(k, 0.0)
    k = k * k
    kv_sc[...] += jnp.dot(k.astype(wv_ref.dtype), wv_ref[...],
                          preferred_element_type=jnp.float32)

    @pl.when(f == nf - 1)
    def _finalize():
        out_ref[...] = (r_sc[...] * kv_sc[...]).astype(out_ref.dtype)


def _make_streamed_wr_kernel(n_f, rc):
    """Wr streamed in (C, rc) column chunks along the f axis: receptance chunk f
    is computed + sigmoided at step f and stored in r_sc[f]; Wr is never
    resident in VMEM as a full (C, C) block."""

    def kernel(x_ref, bnd_ref, mk_ref, mr_ref,
               wk_ref, wv_ref, wr_ref, out_ref,
               xk_sc, xr_sc, r_sc, kv_sc):
        f = pl.program_id(2)

        @pl.when(f == 0)
        def _init():
            x, xx = _token_shift(x_ref, bnd_ref)
            xr_sc[...] = (x + xx * mr_ref[...].astype(jnp.float32)).astype(xr_sc.dtype)
            xk_sc[...] = (x + xx * mk_ref[...].astype(jnp.float32)).astype(xk_sc.dtype)
            kv_sc[...] = jnp.zeros_like(kv_sc)

        # receptance column chunk for this f step
        r = jnp.dot(xr_sc[...], wr_ref[...], preferred_element_type=jnp.float32)
        r_sc[f] = jax.nn.sigmoid(r)                        # (tq, rc) chunk store

        # F-chunked key/value path
        k = jnp.dot(xk_sc[...], wk_ref[...], preferred_element_type=jnp.float32)
        k = jnp.maximum(k, 0.0)
        k = k * k
        kv_sc[...] += jnp.dot(k.astype(wv_ref.dtype), wv_ref[...],
                              preferred_element_type=jnp.float32)

        @pl.when(f == pl.num_programs(2) - 1)
        def _finalize():
            # static unroll over the nF column chunks; all slices are lane-aligned
            for i in range(n_f):
                out_ref[:, i * rc:(i + 1) * rc] = (
                    r_sc[i] * kv_sc[:, i * rc:(i + 1) * rc]
                ).astype(out_ref.dtype)

    return kernel


def channel_mix_forward(x, last_state, time_maa_k, time_maa_r, wk, wv, wr,
                        *, tq=None, f_chunk=None):
    """x: (B, T, C); last_state: (B, C). Returns (out (B,T,C), new_state (B,C))."""
    B, T, C = x.shape
    F = wk.shape[1]
    assert wk.shape == (C, F) and wv.shape == (F, C) and wr.shape == (C, C)

    dflt = _device_defaults()
    tq_target = dflt["tq"] if tq is None else tq
    fc_target = dflt["f_chunk"] if f_chunk is None else f_chunk
    align = dflt["align"]
    vmem_cap = dflt["vmem_cap"]

    act_b = jnp.dtype(x.dtype).itemsize
    w_b = jnp.dtype(wk.dtype).itemsize

    # ---- FFN chunking -------------------------------------------------------
    fc = _choose_f_chunk(F, fc_target)
    nF = F // fc
    stream_wr = (nF > 1) and (C % nF == 0) and ((C // nF) % 128 == 0)
    rc = (C // nF) if stream_wr else C

    # ---- VMEM estimate (incl. pipeline double-buffers + mixing temporaries) --
    def vmem_est(t):
        est = (4 * t * C * act_b              # x + out tiles (double-buffered)
               + 2 * C * act_b                # boundary row
               + 4 * C * 4                    # time_maa_k / time_maa_r (f32)
               + 2 * C * fc * w_b             # Wk chunk
               + 2 * fc * C * w_b             # Wv chunk
               + t * C * w_b                  # xk scratch
               + 2 * t * C * 4                # r + kv scratch (f32)
               + 4 * t * C * 4)               # headroom: f32 mixing temporaries
        if stream_wr:
            est += 2 * C * rc * w_b + t * C * w_b   # Wr column chunk + xr scratch
        else:
            est += 2 * C * C * w_b                  # Wr resident (double-buffered)
        return est

    while tq_target > align and vmem_est(tq_target) > vmem_cap:
        tq_target -= align

    # ---- token tiling (prefer divisors of T: no padding, no output re-copy) --
    tq_eff, Tp = _pick_token_tile(T, tq_target, align)
    nT = Tp // tq_eff
    x_p = jnp.pad(x, ((0, 0), (0, Tp - T), (0, 0))) if Tp != T else x

    # ---- per-tile boundary rows (token-shift seed): (B, nT, 1, C) ------------
    if nT > 1:
        tail = x_p[:, tq_eff - 1:Tp - 1:tq_eff, :]                # (B, nT-1, C)
        boundary = jnp.concatenate([last_state[:, None, :], tail], axis=1)
    else:
        boundary = last_state[:, None, :]
    boundary = boundary[:, :, None, :].astype(x.dtype)            # (B, nT, 1, C)

    mk = time_maa_k.reshape(1, C).astype(jnp.float32)
    mr = time_maa_r.reshape(1, C).astype(jnp.float32)

    est = vmem_est(tq_eff)
    vmem_limit = int(min(vmem_cap, max(32 * 2**20, 2 * est)))

    # ---- honest cost estimate: Wk/Wv (and streamed Wr) are re-fetched for ----
    # ---- every (b, token-tile) pair; constant-index blocks fetched once.  ----
    flops = int(2 * B * Tp * (2 * C * F + C * C))
    transcendentals = int(B * Tp * C)                               # sigmoid
    bytes_accessed = int(2 * B * Tp * C * act_b                     # x in, out
                         + B * nT * C * act_b                       # boundary rows
                         + B * nT * 2 * C * F * w_b                 # Wk + Wv streamed
                         + (B * nT if stream_wr else 1) * C * C * w_b   # Wr
                         + 2 * C * 4)                               # time_maa

    wr_spec = (pl.BlockSpec((C, rc), lambda b, t, f: (0, f)) if stream_wr
               else pl.BlockSpec((C, C), lambda b, t, f: (0, 0)))

    scratch = [pltpu.VMEM((tq_eff, C), wk.dtype)]                   # xk (MXU dtype)
    if stream_wr:
        scratch += [pltpu.VMEM((tq_eff, C), wr.dtype),              # xr (MXU dtype)
                    pltpu.VMEM((nF, tq_eff, rc), jnp.float32)]      # sigmoid(r) chunks
        kernel = _make_streamed_wr_kernel(nF, rc)
    else:
        scratch += [pltpu.VMEM((tq_eff, C), jnp.float32)]           # sigmoid(r)
        kernel = _kernel_resident_wr
    scratch += [pltpu.VMEM((tq_eff, C), jnp.float32)]               # kv accumulator

    out_p = pl.pallas_call(
        kernel,
        out_shape=jax.ShapeDtypeStruct((B, Tp, C), x.dtype),
        grid_spec=pltpu.PrefetchScalarGridSpec(
            num_scalar_prefetch=0,
            grid=(B, nT, nF),
            in_specs=[
                pl.BlockSpec((None, tq_eff, C), lambda b, t, f: (b, t, 0)),      # x
                pl.BlockSpec((None, None, 1, C), lambda b, t, f: (b, t, 0, 0)),  # boundary
                pl.BlockSpec((1, C), lambda b, t, f: (0, 0)),                    # time_maa_k
                pl.BlockSpec((1, C), lambda b, t, f: (0, 0)),                    # time_maa_r
                pl.BlockSpec((C, fc), lambda b, t, f: (0, f)),                   # Wk chunk
                pl.BlockSpec((fc, C), lambda b, t, f: (f, 0)),                   # Wv chunk
                wr_spec,                                                         # Wr
            ],
            out_specs=pl.BlockSpec((None, tq_eff, C), lambda b, t, f: (b, t, 0)),
            scratch_shapes=scratch,
        ),
        compiler_params=pltpu.CompilerParams(
            dimension_semantics=("parallel", "parallel", "arbitrary"),
            vmem_limit_bytes=vmem_limit,
        ),
        cost_estimate=pl.CostEstimate(
            flops=flops,
            transcendentals=transcendentals,
            bytes_accessed=bytes_accessed,
        ),
    )(x_p, boundary, mk, mr, wk, wv, wr)

    out = out_p if Tp == T else out_p[:, :T, :]
    new_state = x[:, -1, :]
    return out, new_state


def make_params(n_embd, dim_ffn, layer_id, n_layer, key, w_dtype=jnp.float32):
    # time_maa_{k,r}: identical deterministic init to the PyTorch __init__
    ratio_1_to_almost0 = 1.0 - layer_id / n_layer
    ddd = jnp.arange(n_embd, dtype=jnp.float32) / n_embd
    time_maa_k = 1.0 - jnp.power(ddd, ratio_1_to_almost0)
    time_maa_r = 1.0 - jnp.power(ddd, ratio_1_to_almost0)

    kk, kv_, kr = jax.random.split(key, 3)
    # stored as (in, out) so the kernel does y = x @ W.  In production pass
    # bf16 (or fp8 on v7x) weights to halve/quarter the streamed weight bytes.
    wk = (jax.random.normal(kk, (n_embd, dim_ffn), jnp.float32) * 0.02).astype(w_dtype)
    wv = (jax.random.normal(kv_, (dim_ffn, n_embd), jnp.float32) * 0.02).astype(w_dtype)
    wr = (jax.random.normal(kr, (n_embd, n_embd), jnp.float32) * 0.02).astype(w_dtype)
    return time_maa_k, time_maa_r, wk, wv, wr


def reference_forward(x, last_state, time_maa_k, time_maa_r, wk, wv, wr):
    x_prev = jnp.concatenate([last_state[:, None, :], x[:, :-1, :]], axis=1)
    xx = x_prev - x
    xk = x + xx * time_maa_k[None, None, :]
    xr = x + xx * time_maa_r[None, None, :]
    k = jnp.maximum(xk @ wk.astype(jnp.float32), 0.0) ** 2
    kv = k @ wv.astype(jnp.float32)
    out = jax.nn.sigmoid(xr @ wr.astype(jnp.float32)) * kv
    return out, x[:, -1, :]


if __name__ == "__main__":
    key = jax.random.PRNGKey(0)
    k_small, k_large = jax.random.split(key)

    # ---- small smoke test: n_embd=32, dim_ffn=128, seq=8, batch=2 -----------
    B, T, C, F = 2, 8, 32, 128
    layer_id, n_layer = 1, 4
    kx, ks, kp = jax.random.split(k_small, 3)
    x = jax.random.normal(kx, (B, T, C), jnp.float32)
    last_state = jax.random.normal(ks, (B, C), jnp.float32)
    time_maa_k, time_maa_r, wk, wv, wr = make_params(C, F, layer_id, n_layer, kp)

    fwd = jax.jit(channel_mix_forward)
    out, new_state = fwd(x, last_state, time_maa_k, time_maa_r, wk, wv, wr)
    out, new_state = jax.block_until_ready((out, new_state))

    ref_out, ref_state = reference_forward(
        x, last_state, time_maa_k, time_maa_r, wk, wv, wr)
    assert out.shape == (B, T, C) and new_state.shape == (B, C)
    assert jnp.allclose(out, ref_out, atol=1e-5, rtol=1e-5)
    assert jnp.allclose(new_state, ref_state)

    # ---- larger test: exercises streamed-Wr path + multi-tile token shift ----
    B2, T2, C2, F2 = 2, 512, 256, 1024
    kx2, ks2, kp2 = jax.random.split(k_large, 3)
    x2 = jax.random.normal(kx2, (B2, T2, C2), jnp.float32)
    ls2 = jax.random.normal(ks2, (B2, C2), jnp.float32)
    p2 = make_params(C2, F2, 1, 4, kp2)

    fwd2 = jax.jit(functools.partial(channel_mix_forward, tq=256, f_chunk=512))
    out2, st2 = fwd2(x2, ls2, *p2)
    out2, st2 = jax.block_until_ready((out2, st2))
    ref_out2, ref_st2 = reference_forward(x2, ls2, *p2)

    rel_err = jnp.linalg.norm(out2 - ref_out2) / jnp.linalg.norm(ref_out2)
    assert out2.shape == (B2, T2, C2) and st2.shape == (B2, C2)
    assert float(rel_err) < 3e-2, float(rel_err)
    assert jnp.allclose(st2, ref_st2)

    print("KERNEL_OK")
</pallas_src>

<mosaic_0001>
module attributes {stable_mosaic.version = 11 : i64} {
  func.func @_kernel_resident_wr(%arg0: i32, %arg1: i32, %arg2: i32, %arg3: memref<1x8x32xf32, #tpu.memory_space<vmem>>, %arg4: memref<1x1x1x32xf32, #tpu.memory_space<vmem>>, %arg5: memref<1x32xf32, #tpu.memory_space<vmem>>, %arg6: memref<1x32xf32, #tpu.memory_space<vmem>>, %arg7: memref<32x128xf32, #tpu.memory_space<vmem>>, %arg8: memref<128x32xf32, #tpu.memory_space<vmem>>, %arg9: memref<32x32xf32, #tpu.memory_space<vmem>>, %arg10: memref<1x8x32xf32, #tpu.memory_space<vmem>>, %arg11: memref<8x32xf32, #tpu.memory_space<vmem>>, %arg12: memref<8x32xf32, #tpu.memory_space<vmem>>, %arg13: memref<8x32xf32, #tpu.memory_space<vmem>>) attributes {dimension_semantics = [#tpu.dimension_semantics<parallel>, #tpu.dimension_semantics<parallel>, #tpu.dimension_semantics<arbitrary>], iteration_bounds = array<i64: 2, 1, 1>, scalar_prefetch = 0 : i64, scratch_operands = 3 : i64, tpu.core_type = #tpu.core_type<tc>, window_params = [{transform_indices = @transform_0, window_bounds = array<i64: 1, 8, 32>}, {transform_indices = @transform_1, window_bounds = array<i64: 1, 1, 1, 32>}, {pipeline_mode = #tpu.pipeline_mode<synchronous>, transform_indices = @transform_2, window_bounds = array<i64: 1, 32>}, {pipeline_mode = #tpu.pipeline_mode<synchronous>, transform_indices = @transform_3, window_bounds = array<i64: 1, 32>}, {transform_indices = @transform_4, window_bounds = array<i64: 32, 128>}, {transform_indices = @transform_5, window_bounds = array<i64: 128, 32>}, {pipeline_mode = #tpu.pipeline_mode<synchronous>, transform_indices = @transform_6, window_bounds = array<i64: 32, 32>}, {transform_indices = @transform_7, window_bounds = array<i64: 1, 8, 32>}]} {
    %c0_i32 = arith.constant 0 : i32
    %0 = arith.cmpi eq, %arg2, %c0_i32 : i32
    %1 = arith.extui %0 : i1 to i32
    %c0_i32_0 = arith.constant 0 : i32
    %2 = arith.cmpi ne, %1, %c0_i32_0 : i32
    scf.if %2 {
      %c0_14 = arith.constant 0 : index
      %c0_15 = arith.constant 0 : index
      %c0_16 = arith.constant 0 : index
      %17 = vector.load %arg3[%c0_14, %c0_15, %c0_16] : memref<1x8x32xf32, #tpu.memory_space<vmem>>, vector<1x8x32xf32>
      %18 = vector.shape_cast %17 : vector<1x8x32xf32> to vector<8x32xf32>
      %c1_i32 = arith.constant 1 : i32
      %19 = tpu.dynamic_rotate %18 by %c1_i32 dim 0 : vector<8x32xf32>, i32 -> vector<8x32xf32>
      %20 = tpu.iota {dimensions = array<i32: 0>} : vector<8x32xi32>
      %c0_i32_17 = arith.constant 0 : i32
      %21 = vector.broadcast %c0_i32_17 : i32 to vector<8x32xi32>
      %22 = arith.cmpi eq, %20, %21 : vector<8x32xi32>
      %c0_18 = arith.constant 0 : index
      %c0_19 = arith.constant 0 : index
      %c0_20 = arith.constant 0 : index
      %c0_21 = arith.constant 0 : index
      %23 = vector.load %arg4[%c0_18, %c0_19, %c0_20, %c0_21] : memref<1x1x1x32xf32, #tpu.memory_space<vmem>>, vector<1x1x1x32xf32>
      %24 = vector.shape_cast %23 : vector<1x1x1x32xf32> to vector<1x32xf32>
      %25 = vector.shape_cast %24 : vector<1x32xf32> to vector<1x32xf32>
      %26 = vector.broadcast %25 : vector<1x32xf32> to vector<8x32xf32>
      %27 = arith.select %22, %26, %19 : vector<8x32xi1>, vector<8x32xf32>
      %28 = arith.subf %27, %18 : vector<8x32xf32>
      %c0_22 = arith.constant 0 : index
      %c0_23 = arith.constant 0 : index
      %29 = vector.load %arg6[%c0_22, %c0_23] : memref<1x32xf32, #tpu.memory_space<vmem>>, vector<1x32xf32>
      %30 = vector.broadcast %29 : vector<1x32xf32> to vector<8x32xf32>
      %31 = arith.mulf %28, %30 : vector<8x32xf32>
      %32 = arith.addf %18, %31 : vector<8x32xf32>
      %c0_24 = arith.constant 0 : index
      %c0_25 = arith.constant 0 : index
      %33 = vector.load %arg9[%c0_24, %c0_25] : memref<32x32xf32, #tpu.memory_space<vmem>>, vector<32x32xf32>
      %cst_26 = arith.constant dense<0.000000e+00> : vector<8x32xf32>
      %34 = tpu.matmul %32, %33, %cst_26 {dimension_numbers = #tpu.dot_dimension_numbers<[1], [0], [0], [1], [0, 0, 1, 1], [], []>} : vector<8x32xf32>, vector<32x32xf32>, vector<8x32xf32> -> vector<8x32xf32>
      %35 = arith.negf %34 : vector<8x32xf32>
      %36 = math.exp %35 : vector<8x32xf32>
      %cst_27 = arith.constant 1.000000e+00 : f32
      %37 = vector.broadcast %cst_27 : f32 to vector<8x32xf32>
      %38 = arith.addf %37, %36 : vector<8x32xf32>
      %39 = arith.divf %37, %38 : vector<8x32xf32>
      %c0_28 = arith.constant 0 : index
      %c0_29 = arith.constant 0 : index
      %40 = vector.load %arg12[%c0_28, %c0_29] : memref<8x32xf32, #tpu.memory_space<vmem>>, vector<8x32xf32>
      tpu.vector_store %arg12[%c0_28, %c0_29], %39 {strides = array<i32>} : memref<8x32xf32, #tpu.memory_space<vmem>>, vector<8x32xf32>,
      %c0_30 = arith.constant 0 : index
      %c0_31 = arith.constant 0 : index
      %41 = vector.load %arg5[%c0_30, %c0_31] : memref<1x32xf32, #tpu.memory_space<vmem>>, vector<1x32xf32>
      %42 = vector.broadcast %41 : vector<1x32xf32> to vector<8x32xf32>
      %43 = arith.mulf %28, %42 : vector<8x32xf32>
      %44 = arith.addf %18, %43 : vector<8x32xf32>
      %c0_32 = arith.constant 0 : index
      %c0_33 = arith.constant 0 : index
      %45 = vector.load %arg11[%c0_32, %c0_33] : memref<8x32xf32, #tpu.memory_space<vmem>>, vector<8x32xf32>
      tpu.vector_store %arg11[%c0_32, %c0_33], %44 {strides = array<i32>} : memref<8x32xf32, #tpu.memory_space<vmem>>, vector<8x32xf32>,
      %cst_34 = arith.constant 0.000000e+00 : f32
      %46 = vector.broadcast %cst_34 : f32 to vector<8x32xf32>
      %c0_35 = arith.constant 0 : index
      %c0_36 = arith.constant 0 : index
      %47 = vector.load %arg13[%c0_35, %c0_36] : memref<8x32xf32, #tpu.memory_space<vmem>>, vector<8x32xf32>
      tpu.vector_store %arg13[%c0_35, %c0_36], %46 {strides = array<i32>} : memref<8x32xf32, #tpu.memory_space<vmem>>, vector<8x32xf32>,
    } else {
    }
    %c0 = arith.constant 0 : index
    %c0_1 = arith.constant 0 : index
    %3 = vector.load %arg11[%c0, %c0_1] : memref<8x32xf32, #tpu.memory_space<vmem>>, vector<8x32xf32>
    %c0_2 = arith.constant 0 : index
    %c0_3 = arith.constant 0 : index
    %4 = vector.load %arg7[%c0_2, %c0_3] : memref<32x128xf32, #tpu.memory_space<vmem>>, vector<32x128xf32>
    %cst = arith.constant dense<0.000000e+00> : vector<8x128xf32>
    %5 = tpu.matmul %3, %4, %cst {dimension_numbers = #tpu.dot_dimension_numbers<[1], [0], [0], [1], [0, 0, 1, 1], [], []>} : vector<8x32xf32>, vector<32x128xf32>, vector<8x128xf32> -> vector<8x128xf32>
    %cst_4 = arith.constant 0.000000e+00 : f32
    %6 = vector.broadcast %cst_4 : f32 to vector<8x128xf32>
    %7 = arith.maximumf %5, %6 : vector<8x128xf32>
    %8 = arith.mulf %7, %7 : vector<8x128xf32>
    %c0_5 = arith.constant 0 : index
    %c0_6 = arith.constant 0 : index
    %9 = vector.load %arg13[%c0_5, %c0_6] : memref<8x32xf32, #tpu.memory_space<vmem>>, vector<8x32xf32>
    %c0_7 = arith.constant 0 : index
    %c0_8 = arith.constant 0 : index
    %10 = vector.load %arg8[%c0_7, %c0_8] : memref<128x32xf32, #tpu.memory_space<vmem>>, vector<128x32xf32>
    %cst_9 = arith.constant dense<0.000000e+00> : vector<8x32xf32>
    %11 = tpu.matmul %8, %10, %cst_9 {dimension_numbers = #tpu.dot_dimension_numbers<[1], [0], [0], [1], [0, 0, 1, 1], [], []>} : vector<8x128xf32>, vector<128x32xf32>, vector<8x32xf32> -> vector<8x32xf32>
    %12 = arith.addf %9, %11 : vector<8x32xf32>
    %c0_10 = arith.constant 0 : index
    %c0_11 = arith.constant 0 : index
    %13 = vector.load %arg13[%c0_10, %c0_11] : memref<8x32xf32, #tpu.memory_space<vmem>>, vector<8x32xf32>
    tpu.vector_store %arg13[%c0_10, %c0_11], %12 {strides = array<i32>} : memref<8x32xf32, #tpu.memory_space<vmem>>, vector<8x32xf32>,
    %c0_i32_12 = arith.constant 0 : i32
    %14 = arith.cmpi eq, %arg2, %c0_i32_12 : i32
    %15 = arith.extui %14 : i1 to i32
    %c0_i32_13 = arith.constant 0 : i32
    %16 = arith.cmpi ne, %15, %c0_i32_13 : i32
    scf.if %16 {
      %c0_14 = arith.constant 0 : index
      %c0_15 = arith.constant 0 : index
      %17 = vector.load %arg12[%c0_14, %c0_15] : memref<8x32xf32, #tpu.memory_space<vmem>>, vector<8x32xf32>
      %c0_16 = arith.constant 0 : index
      %c0_17 = arith.constant 0 : index
      %18 = vector.load %arg13[%c0_16, %c0_17] : memref<8x32xf32, #tpu.memory_space<vmem>>, vector<8x32xf32>
      %19 = arith.mulf %17, %18 : vector<8x32xf32>
      %c0_18 = arith.constant 0 : index
      %c0_19 = arith.constant 0 : index
      %c0_20 = arith.constant 0 : index
      %20 = vector.load %arg10[%c0_18, %c0_19, %c0_20] : memref<1x8x32xf32, #tpu.memory_space<vmem>>, vector<1x8x32xf32>
      %21 = vector.shape_cast %20 : vector<1x8x32xf32> to vector<8x32xf32>
      %22 = vector.shape_cast %19 : vector<8x32xf32> to vector<1x8x32xf32>
      tpu.vector_store %arg10[%c0_18, %c0_19, %c0_20], %22 {strides = array<i32>} : memref<1x8x32xf32, #tpu.memory_space<vmem>>, vector<1x8x32xf32>,
    } else {
    }
    return
  }
  func.func @transform_0(%arg0: i32, %arg1: i32, %arg2: i32) -> (i32, i32, i32) {
    %c0_i32 = arith.constant 0 : i32
    %c0_i32_0 = arith.constant 0 : i32
    return %arg0, %arg1, %c0_i32 : i32, i32, i32
  }
  func.func @transform_1(%arg0: i32, %arg1: i32, %arg2: i32) -> (i32, i32, i32, i32) {
    %c0_i32 = arith.constant 0 : i32
    %c0_i32_0 = arith.constant 0 : i32
    %c0_i32_1 = arith.constant 0 : i32
    return %arg0, %arg1, %c0_i32, %c0_i32_0 : i32, i32, i32, i32
  }
  func.func @transform_2(%arg0: i32, %arg1: i32, %arg2: i32) -> (i32, i32) {
    %c0_i32 = arith.constant 0 : i32
    %c0_i32_0 = arith.constant 0 : i32
    %c0_i32_1 = arith.constant 0 : i32
    return %c0_i32, %c0_i32_0 : i32, i32
  }
  func.func @transform_3(%arg0: i32, %arg1: i32, %arg2: i32) -> (i32, i32) {
    %c0_i32 = arith.constant 0 : i32
    %c0_i32_0 = arith.constant 0 : i32
    %c0_i32_1 = arith.constant 0 : i32
    return %c0_i32, %c0_i32_0 : i32, i32
  }
  func.func @transform_4(%arg0: i32, %arg1: i32, %arg2: i32) -> (i32, i32) {
    %c0_i32 = arith.constant 0 : i32
    %c0_i32_0 = arith.constant 0 : i32
    return %c0_i32, %arg2 : i32, i32
  }
  func.func @transform_5(%arg0: i32, %arg1: i32, %arg2: i32) -> (i32, i32) {
    %c0_i32 = arith.constant 0 : i32
    %c0_i32_0 = arith.constant 0 : i32
    return %arg2, %c0_i32 : i32, i32
  }
  func.func @transform_6(%arg0: i32, %arg1: i32, %arg2: i32) -> (i32, i32) {
    %c0_i32 = arith.constant 0 : i32
    %c0_i32_0 = arith.constant 0 : i32
    %c0_i32_1 = arith.constant 0 : i32
    return %c0_i32, %c0_i32_0 : i32, i32
  }
  func.func @transform_7(%arg0: i32, %arg1: i32, %arg2: i32) -> (i32, i32, i32) {
    %c0_i32 = arith.constant 0 : i32
    %c0_i32_0 = arith.constant 0 : i32
    return %arg0, %arg1, %c0_i32 : i32, i32, i32
  }
}

</mosaic_0001>

<bundles_post_ra>
// kernel: channel_mix_forward.1
= control target key start
LH: loop header
LB: loop body
LE: loop exit
PB: predicated region body
PF: predicated region fallthrough
CT: control target
= control target key end

     0   :  { %12 = vsyncpa [#allocation6], 0  ;;  %s1304_s0 = inlined_call_operand.vmem [shape: f32[2,8,32], index: 0, kind: input, shape index: {}]   ;;  %s1305_s1 = inlined_call_operand.vmem [shape: f32[2,1,1,32], index: 1, kind: input, shape index: {}]   ;;  %s1306_s2 = inlined_call_operand.vmem [shape: f32[1,32], index: 2, kind: input, shape index: {}]   ;;  %s1307_s3 = inlined_call_operand.vmem [shape: f32[1,32], index: 3, kind: input, shape index: {}]   ;;  %s1308_s4 = inlined_call_operand.vmem [shape: f32[32,128], index: 4, kind: input, shape index: {}]   ;;  %s1309_s5 = inlined_call_operand.vmem [shape: f32[128,32], index: 5, kind: input, shape index: {}]   ;;  %s1310_s6 = inlined_call_operand.vmem [shape: f32[32,32], index: 6, kind: input, shape index: {}]   ;;  %s1311_s7 = inlined_call_operand.hbm [shape: f32[2,8,32], index: 7, kind: output, shape index: {}]  }
   0x1   :  { %14 = vsyncpa [#allocation6 + $0x1], 0  ;;  %s1086_s24 = smov 0   ;;  %s1088_s25 = smov 0  }
   0x2   :  { %s1090_s26 = smov 0   ;;  %s1092_s27 = smov 0  }
   0x3   :  { %s1094_s28 = smov 0   ;;  %s1096_s29 = smov 0  }
   0x4 LB: > { %s801_s30 = sadd.s32 4294967295, %s1041_s29   ;;  %s802_s8 = sadd.s32 4294967294, %s1041_s29   ;;  %s1041_s29 = sphi %s1096_s29, %s20_s29   ;;  %s1037_s28 = sphi %s1094_s28, %s1318_s28   ;;  %s1033_s27 = sphi %s1092_s27, %s1317_s27   ;;  %s1029_s26 = sphi %s1090_s26, %s1316_s26   ;;  %s1025_s25 = sphi %s1088_s25, %s1315_s25   ;;  %s1021_s24 = sphi %s1086_s24, %s1314_s24  }
   0x5   : > { %s39_s9 = sadd.s32 1, %s1037_s28  ;;  %s219_s10 = sadd.s32 1, %s1029_s26 }
   0x6   : > { %p41_p0 = scmp.ge.s32.totalorder %s39_s9, 2  ;;  %p229_p1 = scmp.ne.s32.totalorder %s1029_s26, %s1025_s25 }
   0x7   : > { %p230_p2 = scmp.eq.s32.totalorder %s801_s30, 1  ;;  %p235_p3 = scmp.ne.s32.totalorder %s1025_s25, %s1021_s24 }
   0x8   : > { %s1320_s9 = smov (%p41_p0, %s39_s9), 0  ;;  %p236_p5 = scmp.eq.s32.totalorder %s802_s8, 1 }
   0x9   : > { %p1126_p4 = por %p230_p2, %p229_p1  ;;  %s214_s12 = ssub.s32 %s1037_s28, %s1320_s9 }
   0xa   : > { %p807_p6 = scmp.ge.s32.totalorder %s1041_s29, 1  ;;  %p217_p7 = scmp.eq.s32.totalorder %s214_s12, 0 }
   0xb   : > { %p1133_p8 = por %p236_p5, %p235_p3  ;;  %p298_p9 = scmp.lt.s32.totalorder %s1041_s29, 3 }
   0xc   : > { %s1139_s14 = scalar_select %p217_p7, %s1029_s26, %s219_s10  }
   0xd   : > { %p299_p10 = pnand %p807_p6, %p298_p9 }
   0xe   : > { %p347_p11 = scmp.lt.s32.totalorder (!%p299_p10), %s1033_s27, 1  ;;  %s344_s30 = sand.u32 (!%p299_p10), 1, %s1025_s25  }
   0xf   : > { %302 = sbr.rel (%p299_p10) target bundleno = 458 (0x1ca), region = 48  ;;  %s817_s8 = sshll.u32 (!%p299_p10), %s1033_s27, 7 }
  0x10   : > { %s671_s18 = scalar_lea.sflag (!%p299_p10), [#allocation6], %s344_s30  ;;  %s1045_s21 = smov (!%p299_p10), [#allocation5]  }
  0x14   : > { %v400_v0 = vld [vmem:[%s1310_s6 + $0x18] sm:$0xff]  ;;  %v376_v1 = vlaneseq  ;;  %v1043_v2 = vmov 0.0   ;;  %v399_v3 = vld [vmem:[%s1310_s6 + $0x10] sm:$0xff]  ;;  %vm1044_vm0 = vmmov 0   ;;  %vm401_vm1 = vcmask 261120   ;;  %s348_s19 = scalar_select %p347_p11, %s1033_s27, 1 }
  0x15   : > { %847 = vmatprep.subr.mxu1 %v1043_v2  ;;  %855 = vmatprep.mubr.msk.f32.mxu1 %vm1044_vm0, %v1043_v2  ;;  %492 = vst.msk [vmem:[#allocation4] sm:$0xff] %vm401_vm1, %v1043_v2  ;;  %v398_v5 = vld [vmem:[%s1310_s6 + $0x8] sm:$0xff]  ;;  %v590_v6 = vld [vmem:[%s1309_s5 + $0x78] sm:$0xff]  ;;  %v589_v7 = vld [vmem:[%s1309_s5 + $0x70] sm:$0xff]  ;;  %s969_s27 = sshll.u32 %s1045_s21, 4  ;;  %s970_s27 = int_to_ptr.vmem [resolvable:$false] %s969_s27 }
  0x16   : > { %848 = vmatpush3.msra.mxu1 %v400_v0  ;;  %v377_v4 = vshrl.u32 %v376_v1, 7  ;;  %869 = vmatprep.subr.mxu0 %v1043_v2  ;;  %s809_s10 = sshll.u32 %s348_s19, 3  ;;  %s359_s16 = scalar_lea.vmem %s1305_s1, %s348_s19  ;;  %v397_v8 = vld [vmem:[%s1310_s6] sm:$0xff]  ;;  %v588_v9 = vld [vmem:[%s1309_s5 + $0x68] sm:$0xff]  ;;  %v586_v17 = vld [vmem:[%s1309_s5 + $0x58] sm:$0xff] }
  0x17   : > { %849 = vmatprep.subr.mxu1 %v1043_v2  ;;  %901 = vmatprep.mubr.msk.f32.mxu0 %vm1044_vm0, %v1043_v2  ;;  %s353_s22 = scalar_lea.vmem %s1304_s0, %s809_s10  ;;  %v810_v11 = vld [vmem:[%s359_s16] ss:$0 sm:$0xff]  ;;  %v585_v19 = vld [vmem:[%s1309_s5 + $0x50] sm:$0xff]  ;;  %v584_v22 = vld [vmem:[%s1309_s5 + $0x48] sm:$0xff]  ;;  %s808_s19 = sshll.u32 %s344_s30, 3 }
  0x18   : > { %850 = vmatpush3.msra.mxu1 %v399_v3  ;;  %870 = vmatpush3.msra.mxu0 %v590_v6  ;;  %v374_v10 = vld [vmem:[%s353_s22] sm:$0xff]  ;;  %vm378_vm2 = vcmp.eq.s32.totalorder %v377_v4, 0  ;;  %v497_v25 = vld [vmem:[%s1308_s4 + $0x18] sm:$0xff]  ;;  %v496_v26 = vld [vmem:[%s1308_s4 + $0x10] sm:$0xff]  ;;  %s346_s10 = scalar_lea.vmem [#allocation5], %s808_s19  ;;  %s683_s16 = scalar_lea.hbm %s1311_s7, %s817_s8 }
  0x19   : > { %851 = vmatprep.subr.mxu1 %v1043_v2  ;;  %871 = vmatprep.subr.mxu0 %v1043_v2  ;;  %v375_v12 = vrot.slane %v374_v10, 7  ;;  %v587_v13 = vld [vmem:[%s1309_s5 + $0x60] sm:$0xff]  ;;  %v495_v28 = vld [vmem:[%s1308_s4 + $0x8] sm:$0xff]  ;;  %v582_v29 = vld [vmem:[%s1309_s5 + $0x38] sm:$0xff]  ;;  %s685_s12 = sshll.u32 %s346_s10, 4  ;;  %s971_s22 = scalar_lea.vmem %s970_s27, 256  ;;  %s686_s12 = int_to_ptr.vmem [resolvable:$true] %s685_s12 }
  0x1a   : > { %852 = vmatpush3.msra.mxu1 %v398_v5  ;;  %872 = vmatpush3.msra.mxu0 %v589_v7  ;;  %v811_v15 = vld [vmem:[%s1307_s3] ss:$0 sm:$0xff]  ;;  %v581_v32 = vld [vmem:[%s1309_s5 + $0x30] sm:$0xff]  ;;  %v580_v33 = vld [vmem:[%s1309_s5 + $0x28] sm:$0xff]  ;;  %s965_s20 = scalar_lea.vmem %s686_s12, 128  ;;  %p972_p1 = scmp.lt.s32.totalorder %s686_s12, %s970_s27 }
  0x1b   : > { %853 = vmatprep.subr.mxu1 %v1043_v2  ;;  %873 = vmatprep.subr.mxu0 %v1043_v2  ;;  %v386_v14 = vsel %vm378_vm2, %v810_v11, %v375_v12  ;;  %v814_v16 = vld [vmem:[%s1306_s2] ss:$0 sm:$0xff]  ;;  %v578_v35 = vld [vmem:[%s1309_s5 + $0x18] sm:$0xff]  ;;  %v577_v36 = vld [vmem:[%s1309_s5 + $0x10] sm:$0xff]  ;;  %p966_p12 = scmp.ne.s32.totalorder %s686_s12, %s965_s20  ;;  %p973_p2 = scmp.lt.s32.totalorder %s971_s22, %s965_s20 }
  0x1c   : > { %854 = vmatpush3.msra.mxu1 %v397_v8  ;;  %874 = vmatpush3.msra.mxu0 %v588_v9  ;;  %v387_v18 = vsub.f32 %v386_v14, %v374_v10  ;;  %v583_v27 = vld [vmem:[%s1309_s5 + $0x40] sm:$0xff]  ;;  %v576_v37 = vld [vmem:[%s1309_s5 + $0x8] sm:$0xff]  ;;  %v574_v49 = vld [vmem:[#allocation4] sm:$0xff] }
  0x1d   : > { %858 = vmatprep.subr.mxu1 %v1043_v2  ;;  %875 = vmatprep.subr.mxu0 %v1043_v2  ;;  %v494_v30 = vld [vmem:[%s1308_s4] sm:$0xff]  ;;  %p967_p13 = pnand %p966_p12, %p1126_p4  ;;  %p974_p3 = por %p973_p2, %p972_p1 }
  0x1e   : > { %876 = vmatpush3.msra.mxu0 %v587_v13  ;;  %v395_v20 = vmul.f32 %v811_v15, %v387_v18  ;;  %v489_v21 = vmul.f32 %v814_v16, %v387_v18  ;;  %v579_v34 = vld [vmem:[%s1309_s5 + $0x20] sm:$0xff] }
  0x1f   : > { %877 = vmatprep.subr.mxu0 %v1043_v2  ;;  %v575_v38 = vld [vmem:[%s1309_s5] sm:$0xff]  ;;  %p968_p0 = pneg %p967_p13 }
  0x20   : > { %878 = vmatpush3.msra.mxu0 %v586_v17  ;;  %v396_v23 = vadd.f32 %v395_v20, %v374_v10  ;;  %v490_v24 = vadd.f32 %v489_v21, %v374_v10 }
  0x21   : > { %879 = vmatprep.subr.mxu0 %v1043_v2  ;;  %p975_p5 = pnand %p974_p3, %p968_p0 }
  0x22   : > { %880 = vmatpush3.msra.mxu0 %v585_v19  ;;  %856 = vmatmul.mubr.msk.f32.vlgmr.msra.gmra.mxu1 %vm401_vm1, %v396_v23  ;;  %491 = vst.msk [vmem:[#allocation2] sm:$0xff] %vm401_vm1, %v490_v24 }
  0x23   : > { %881 = vmatprep.subr.mxu0 %v1043_v2  ;;  %859 = vmatpush3.msra.mxu1 %v497_v25 }
  0x24   : > { %882 = vmatpush3.msra.mxu0 %v584_v22  ;;  %866 = vmatprep.mubr.msk.f32.mxu1 %vm1044_vm0, %v1043_v2 }
  0x25   : > { %860 = vmatprep.subr.mxu1 %v1043_v2  ;;  %883 = vmatprep.subr.mxu0 %v1043_v2 }
  0x26   : > { %861 = vmatpush3.msra.mxu1 %v496_v26  ;;  %884 = vmatpush3.msra.mxu0 %v583_v27 }
  0x27   : > { %862 = vmatprep.subr.mxu1 %v1043_v2  ;;  %885 = vmatprep.subr.mxu0 %v1043_v2 }
  0x28   : > { %863 = vmatpush3.msra.mxu1 %v495_v28  ;;  %886 = vmatpush3.msra.mxu0 %v582_v29 }
  0x29   : > { %864 = vmatprep.subr.mxu1 %v1043_v2  ;;  %887 = vmatprep.subr.mxu0 %v1043_v2  ;;  %v493_v31 = vld [vmem:[#allocation2] sm:$0xff] }
  0x2a   : > { %865 = vmatpush3.msra.mxu1 %v494_v30  ;;  %888 = vmatpush3.msra.mxu0 %v581_v32 }
  0x2b   : > { %867 = vmatmul.mubr.msk.f32.vlgmr.msra.gmra.mxu1 %vm401_vm1, %v493_v31  ;;  %889 = vmatprep.subr.mxu0 %v1043_v2 }
  0x2c   : > { %890 = vmatpush3.msra.mxu0 %v580_v33 }
  0x2d   : > { %891 = vmatprep.subr.mxu0 %v1043_v2 }
  0x2e   : > { %892 = vmatpush3.msra.mxu0 %v579_v34 }
  0x2f   : > { %893 = vmatprep.subr.mxu0 %v1043_v2 }
  0x30   : > { %894 = vmatpush3.msra.mxu0 %v578_v35 }
  0x31   : > { %895 = vmatprep.subr.mxu0 %v1043_v2 }
  0x32   : > { %896 = vmatpush3.msra.mxu0 %v577_v36 }
  0x33   : > { %897 = vmatprep.subr.mxu0 %v1043_v2 }
  0x34   : > { %898 = vmatpush3.msra.mxu0 %v576_v37 }
  0x35   : > { %899 = vmatprep.subr.mxu0 %v1043_v2 }
  0x36   : > { %900 = vmatpush3.msra.mxu0 %v575_v38 }
  0xe2   : > { %v471_v39 = vpop.f32.mrf.mxu1 }
  0xe3   : > { %v813_v40 = vmul.f32 -1.442695, %v471_v39 }
  0xe4   : > { %v857_v41 = vpop.f32.mrf.mxu1 }
  0xe5   : > { %961 = vpow2.f32 %v813_v40 }
  0xeb   : > { %v568_v42 = vpop.f32.mrf.mxu1 }
  0xec   : > { %v572_v43 = vmax.f32 %v568_v42, 0.0 }
  0xed   : > { %v868_v44 = vpop.f32.mrf.mxu1 }
  0xee   : > { %v573_v45 = vmul.f32 %v572_v43, %v572_v43 }
  0xf0   : > { %902 = vmatmul.mubr.f32.vlgmr.msra.gmra.mxu0 %v573_v45 }
  0xf2   : > { %v962_v46 = vpop.eup %961 }
  0xf3   : > { %v478_v47 = vadd.f32 1.0, %v962_v46 }
  0xf5   : > { %963 = vrcp.f32 %v478_v47 }
 0x102   : > { %v964_v48 = vpop.eup %963 }
 0x103   : > { %481 = vst.msk [vmem:[#allocation3] sm:$0xff] %vm401_vm1, %v964_v48 }
 0x10a   : > { %v666_v53 = vld [vmem:[#allocation3] sm:$0xff] }
 0x1b0   : > { %v657_v50 = vpop.f32.mrf.mxu0 }
 0x1b1   : > { %v661_v51 = vadd.f32 %v657_v50, %v574_v49 }
 0x1b2   : > { %v903_v52 = vpop.f32.mrf.mxu0 }
 0x1b3   : > { %662 = vst.msk [vmem:[#allocation4] sm:$0xff] %vm401_vm1, %v661_v51 }
 0x1ba   : > { %v667_v54 = vld [vmem:[#allocation4] sm:$0xff] }
 0x1bb   : > { %v668_v55 = vmul.f32 %v667_v54, %v666_v53 }
 0x1bd   : > { %669 = vst.msk [vmem:[%s346_s10] sm:$0xff] %vm401_vm1, %v668_v55 }
 0x1be   : > { %978 = shalt.err (!%p975_p5)
}
 0x1bf   : > { %s979_s23 = scalar_lea.hbm %s683_s16, 128  ;;  %s983_s8 = scalar_lea.hbm %s1311_s7, 256 }
 0x1c0   : > { %p980_p6 = scmp.ne.s32.totalorder %s683_s16, %s979_s23  ;;  %p984_p10 = scmp.lt.s32.totalorder %s683_s16, %s1311_s7 }
 0x1c1   : > { %p985_p11 = scmp.lt.s32.totalorder %s983_s8, %s979_s23 }
 0x1c2   : > { %p981_p7 = pnand %p980_p6, %p1126_p4 }
 0x1c3   : > { %p986_p12 = por %p985_p11, %p984_p10 }
 0x1c4   : > { %p982_p9 = pneg %p981_p7 }
 0x1c6   : > { %p987_p13 = pnand %p986_p12, %p982_p9 }
 0x1c8   : > { %990 = shalt.err (!%p987_p13)
}
 0x1c9   : > { %904 = dma.vmem_to_hbm [thread:$0]  (%p1126_p4), %s686_s12, 128, %s683_s16, %s671_s18  }
 0x1ca PF: > { %p910_p0 = scmp.ge.s32.totalorder %s1041_s29, 2  ;;  %s697_s17 = sand.u32 1, %s1021_s24  }
 0x1cb   : > { %s698_s20 = scalar_lea.sflag [#allocation6], %s697_s17 }
 0x1cc   : > { %p907_p1 = pnand %p910_p0, %p1133_p8 }
 0x1ce   : > { %p908_p2 = pneg %p907_p1 }
 0x1d0   : > { %1016 = dma.done.wait (%p908_p2), %s698_s20, 128  }
 0x1d1   : > { %1018 = vsyncadd (%p908_p2), %s698_s20, 4294967168  ;;  %s20_s29 = sadd.s32 1, %s1041_s29   ;;  %s1314_s24 = smov %s1025_s25 }
 0x1d2   : > { %p17_p3 = scmp.ge.s32.totalorder %s20_s29, 4   ;;  %s1315_s25 = smov %s1029_s26 }
 0x1d3   : > { %s1316_s26 = smov %s1139_s14  ;;  %s1317_s27 = smov %s1037_s28 }
 0x1d4   : > { %s1318_s28 = smov %s1320_s9  ;;  %19 = sbr.rel (!%p17_p3) target bundleno = 4 (0x4), region = 100 }
 0x1d9   :  { %703 = vsyncpa [#allocation6], 1 }
 0x1da   :  { %705 = vsyncpa [#allocation6 + $0x1], 1 }

</bundles_post_ra>
